<compile_context>
chip_gen: v7x
topology: tpu7x:2x2x1
jax: 0.10.0
libtpu: 0.0.40
codegen_flags: <defaults>
</compile_context>

<pallas_src>
import functools
import math

import jax
import jax.numpy as jnp
from jax import lax
from jax.experimental import pallas as pl
from jax.experimental.pallas import tpu as pltpu

EPS = 1e-12  # F.normalize default eps

_MLAMBDA = [
    lambda x: x ** 0,
    lambda x: x ** 1,
    lambda x: 2.0 * x ** 2 - 1.0,
    lambda x: 4.0 * x ** 3 - 3.0 * x,
    lambda x: 8.0 * x ** 4 - 8.0 * x ** 2 + 1.0,
    lambda x: 16.0 * x ** 5 - 20.0 * x ** 3 + 5.0 * x,
]


def _pow_neg1(k):
    """(-1)**k for non-negative integer-valued float k (no NaN from pow)."""
    return 1.0 - 2.0 * (k - 2.0 * jnp.floor(k * 0.5))


# ---------------------------------------------------------------------------
# One-shot row L2-normalization kernel (used for x only; W norm is fused).
# ---------------------------------------------------------------------------
def _row_normalize_kernel(x_ref, o_ref):
    x = x_ref[...].astype(jnp.float32)
    ss = jnp.sum(x * x, axis=-1, keepdims=True)
    # x / max(||x||, eps)  ==  x * rsqrt(max(||x||^2, eps^2))   (within eps)
    o_ref[...] = (x * lax.rsqrt(jnp.maximum(ss, EPS * EPS))).astype(o_ref.dtype)


def row_normalize(x, *, tile_r=256, out_dtype=None):
    R, D = x.shape
    tile_r = min(tile_r, R)
    assert R % tile_r == 0, (R, tile_r)
    out_dtype = out_dtype or x.dtype
    return pl.pallas_call(
        _row_normalize_kernel,
        out_shape=jax.ShapeDtypeStruct((R, D), out_dtype),
        grid_spec=pltpu.PrefetchScalarGridSpec(
            num_scalar_prefetch=0,
            grid=(R // tile_r,),
            in_specs=[pl.BlockSpec((tile_r, D), lambda i: (i, 0))],
            out_specs=pl.BlockSpec((tile_r, D), lambda i: (i, 0)),
        ),
        compiler_params=pltpu.CompilerParams(
            dimension_semantics=("parallel",)),
    )(x)


# ---------------------------------------------------------------------------
# Margin function psi(theta), selected at trace time (like the torch branches).
# ---------------------------------------------------------------------------
def _make_psi_fn(m1, m2):
    if m1 == 1 and m2 != 0.0:
        cos_m2, sin_m2 = math.cos(m2), math.sin(m2)

        def psi(cosine):
            # max(.,0) guards fp-rounding NaNs when |cosine| ~ 1 (incl. bf16 MXU)
            sine = jnp.sqrt(jnp.maximum(1.0 - cosine * cosine, 0.0))
            p = cosine * cos_m2 - sine * sin_m2
            return jnp.where(cosine > -cos_m2, p, -p - 2.0)
        return psi

    if m2 == 0.0 and m1 != 1:
        def psi(cosine):
            c = jnp.clip(cosine, -1.0, 1.0)   # keep arccos NaN-free
            cos_m1_theta = _MLAMBDA[m1](c)
            theta = jnp.arccos(c)
            k = jnp.floor(m1 * theta / math.pi)
            return _pow_neg1(k) * cos_m1_theta - 2.0 * k
        return psi

    def psi(cosine):
        c = jnp.clip(cosine, -1.0, 1.0)       # keep arccos NaN-free
        theta = jnp.arccos(c)
        ang = m1 * theta + m2
        k = jnp.floor(ang / math.pi)
        return _pow_neg1(k) * jnp.cos(ang) - 2.0 * k
    return psi


# ---------------------------------------------------------------------------
# Main kernels (weight-stationary grid: class tiles outer, batch tiles inner).
# ---------------------------------------------------------------------------
def _normalize_w_tile(w_ref, wn_ref):
    """L2-normalize the raw (tile_c, D) f32 weight tile into VMEM scratch."""
    w = w_ref[...].astype(jnp.float32)
    ss = jnp.sum(w * w, axis=-1, keepdims=True)
    wn_ref[...] = (w * lax.rsqrt(jnp.maximum(ss, EPS * EPS))).astype(wn_ref.dtype)


def _cosine_kernel(xn_ref, w_ref, out_ref, wn_ref, *, s):
    # Weight tile is the same for every inner (batch) step: normalize once.
    @pl.when(pl.program_id(1) == 0)
    def _():
        _normalize_w_tile(w_ref, wn_ref)

    cosine = lax.dot_general(
        xn_ref[...], wn_ref[...],
        dimension_numbers=(((1,), (1,)), ((), ())),
        preferred_element_type=jnp.float32)
    out_ref[...] = (cosine * s).astype(out_ref.dtype)


def _margin_kernel(label_ref, xn_ref, w_ref, out_ref, wn_ref, *,
                   tile_c, psi_fn, lambd, s):
    j = pl.program_id(0)   # class-tile index (outer, weight-stationary)

    @pl.when(pl.program_id(1) == 0)
    def _():
        _normalize_w_tile(w_ref, wn_ref)

    cosine = lax.dot_general(
        xn_ref[...], wn_ref[...],
        dimension_numbers=(((1,), (1,)), ((), ())),
        preferred_element_type=jnp.float32)

    labels = label_ref[...]                       # (tile_b, 1) int32
    lo = j * tile_c
    in_tile = jnp.logical_and(labels >= lo, labels < lo + tile_c)
    hit_any = jnp.max(in_tile.astype(jnp.int32)) > 0

    # Only class tiles that actually contain a label pay for psi (EUP/VALU).
    @pl.when(hit_any)
    def _():
        psi = psi_fn(cosine)
        if lambd != 1.0:
            psi = psi * lambd + cosine * (1.0 - lambd)
        class_ids = lo + lax.broadcasted_iota(jnp.int32, cosine.shape, 1)
        hit = class_ids == labels                 # (tile_b, 1) broadcasts
        out_ref[...] = (jnp.where(hit, psi, cosine) * s).astype(out_ref.dtype)

    @pl.when(jnp.logical_not(hit_any))
    def _():
        out_ref[...] = (cosine * s).astype(out_ref.dtype)


def margin_linear_forward(x, weight, m1=1, m2=0.0, label=None, lambd=1.0,
                          s=64.0, *, tile_b=256, tile_c=1024,
                          matmul_dtype=jnp.bfloat16, out_dtype=jnp.float32,
                          vmem_limit_bytes=None):
    """Pallas forward of MarginLinear.forward(input, m1, m2, label, lambd).

    matmul_dtype: bf16 by default (f32 accumulation; psi math in f32) on all
    generations -- halves x/scratch bytes and doubles MXU throughput; pass
    jnp.float32 for bit-tight validation.
    out_dtype: keep f32 for torch parity; bf16 halves the dominant B*C output
    HBM stream when the consumer tolerates it.
    Tile budget: the weight tile (tile_c * D) is the big VMEM consumer; keep
    double-buffered totals under ~48 MiB on v7x (64 MiB VMEM), and set
    vmem_limit_bytes explicitly on v5e (16 MiB scoped default) / v6e (32 MiB)
    when enlarging tiles.  Tiles are multiples of 128 for the MXU.
    """
    B, D = x.shape
    C, D2 = weight.shape
    assert D == D2, (D, D2)
    tile_b = min(tile_b, B)
    tile_c = min(tile_c, C)
    # TODO(synk): remainder handling -- pad or use masked final tiles when
    # B/C are not multiples of the tile sizes.
    assert B % tile_b == 0 and C % tile_c == 0, (B, tile_b, C, tile_c)

    mm_dtype = matmul_dtype or x.dtype
    # Hoisted: normalize x exactly once (it is re-streamed per class tile).
    # Weight normalization is fused into the main kernel (W is read once).
    xn = row_normalize(x, out_dtype=mm_dtype)

    compiler_params = pltpu.CompilerParams(
        # Class axis (outer) parallel -> on v7x each TensorCore streams a
        # disjoint half of W.  Batch axis must be arbitrary because the
        # normalized-weight scratch is reused across the inner sweep.
        dimension_semantics=("parallel", "arbitrary"),
        vmem_limit_bytes=vmem_limit_bytes)

    # Weight-stationary grid: class tiles outer, batch tiles inner, so each
    # (tile_c, D) weight tile is DMA'd from HBM exactly once per forward.
    grid = (C // tile_c, B // tile_b)
    out_shape = jax.ShapeDtypeStruct((B, C), out_dtype)
    x_spec = pl.BlockSpec((tile_b, D), lambda j, i: (i, 0))
    w_spec = pl.BlockSpec((tile_c, D), lambda j, i: (j, 0))
    o_spec = pl.BlockSpec((tile_b, tile_c), lambda j, i: (i, j))
    # TODO(synk): for D beyond ~2K on v7x, add a K grid axis ("arbitrary")
    # with an f32 accumulator scratch instead of holding the full (tile_c, D)
    # weight slab in VMEM.
    scratch = [pltpu.VMEM((tile_c, D), mm_dtype)]   # normalized weight tile

    m1 = int(m1)
    if label is None or (m1 == 1 and m2 == 0):
        kernel = functools.partial(_cosine_kernel, s=float(s))
        return pl.pallas_call(
            kernel,
            out_shape=out_shape,
            grid_spec=pltpu.PrefetchScalarGridSpec(
                num_scalar_prefetch=0,
                grid=grid,
                in_specs=[x_spec, w_spec],
                out_specs=o_spec,
                scratch_shapes=scratch,
            ),
            compiler_params=compiler_params,
        )(xn, weight)

    psi_fn = _make_psi_fn(m1, float(m2))
    label2d = label.astype(jnp.int32).reshape(B, 1)
    kernel = functools.partial(_margin_kernel, tile_c=tile_c, psi_fn=psi_fn,
                               lambd=float(lambd), s=float(s))
    return pl.pallas_call(
        kernel,
        out_shape=out_shape,
        grid_spec=pltpu.PrefetchScalarGridSpec(
            num_scalar_prefetch=0,
            grid=grid,
            in_specs=[pl.BlockSpec((tile_b, 1), lambda j, i: (i, 0)),
                      x_spec, w_spec],
            out_specs=o_spec,
            scratch_shapes=scratch,
        ),
        compiler_params=compiler_params,
    )(label2d, xn, weight)


# ---------------------------------------------------------------------------
# Plain-JAX reference (mirrors the torch forward).
# ---------------------------------------------------------------------------
def _reference(x, weight, m1=1, m2=0.0, label=None, lambd=1.0, s=64.0):
    xn = x / jnp.maximum(jnp.linalg.norm(x, axis=-1, keepdims=True), EPS)
    wn = weight / jnp.maximum(
        jnp.linalg.norm(weight, axis=-1, keepdims=True), EPS)
    cosine = xn @ wn.T
    m1 = int(m1)
    if label is None or (m1 == 1 and m2 == 0):
        return cosine * s
    if m1 == 1 and m2 != 0:
        sine = jnp.sqrt(jnp.maximum(1.0 - cosine ** 2, 0.0))
        psi = cosine * math.cos(m2) - sine * math.sin(m2)
        psi = jnp.where(cosine > -math.cos(m2), psi, -psi - 2.0)
    elif m2 == 0 and m1 != 1:
        cos_m1_theta = _MLAMBDA[m1](cosine)
        theta = jnp.arccos(cosine)
        k = jnp.floor(m1 * theta / math.pi)
        psi = _pow_neg1(k) * cos_m1_theta - 2.0 * k
    else:
        theta = jnp.arccos(cosine)
        ang = m1 * theta + m2
        k = jnp.floor(ang / math.pi)
        psi = _pow_neg1(k) * jnp.cos(ang) - 2.0 * k
    one_hot = jnp.arange(weight.shape[0])[None, :] == label[:, None]
    return jnp.where(one_hot, psi * lambd + cosine * (1.0 - lambd), cosine) * s


if __name__ == "__main__":
    # Small shapes consistent with the module: batch=16, in_features=32,
    # out_features (num classes)=16.
    B, D, C = 16, 32, 16

    key = jax.random.PRNGKey(0)
    kx, kw, kl = jax.random.split(key, 3)

    # Deterministic xavier_uniform_ style init for weight (out, in)
    bound = math.sqrt(6.0 / (D + C))
    weight = jax.random.uniform(
        kw, (C, D), minval=-bound, maxval=bound, dtype=jnp.float32)
    x = jax.random.normal(kx, (B, D), dtype=jnp.float32)
    label = jax.random.randint(kl, (B,), 0, C, dtype=jnp.int32)

    # --- f32 MXU path: tight validation vs pure-JAX reference -------------
    out_margin_f32 = jax.block_until_ready(
        margin_linear_forward(x, weight, m1=1, m2=0.5, label=label,
                              matmul_dtype=jnp.float32))
    ref_margin = _reference(x, weight, m1=1, m2=0.5, label=label)
    assert out_margin_f32.shape == (B, C)
    assert jnp.allclose(out_margin_f32, ref_margin, atol=1e-3, rtol=1e-3), (
        "f32 margin branch mismatch vs reference")

    out_plain_f32 = jax.block_until_ready(
        margin_linear_forward(x, weight, matmul_dtype=jnp.float32))
    ref_plain = _reference(x, weight)
    assert jnp.allclose(out_plain_f32, ref_plain, atol=1e-3, rtol=1e-3), (
        "f32 cosine branch mismatch vs reference")

    # --- default bf16 MXU path: looser tolerance (bf16 operand rounding) ---
    out_margin_bf16 = jax.block_until_ready(
        margin_linear_forward(x, weight, m1=1, m2=0.5, label=label))
    assert jnp.allclose(out_margin_bf16, ref_margin, atol=0.5, rtol=1e-2), (
        "bf16 margin branch mismatch vs reference")

    out_plain_bf16 = jax.block_until_ready(margin_linear_forward(x, weight))
    assert jnp.allclose(out_plain_bf16, ref_plain, atol=0.5, rtol=1e-2), (
        "bf16 cosine branch mismatch vs reference")

    print("KERNEL_OK")
</pallas_src>

<mosaic_0001>
module attributes {stable_mosaic.version = 11 : i64} {
  func.func @_row_normalize_kernel(%arg0: i32, %arg1: memref<16x32xf32, #tpu.memory_space<vmem>>, %arg2: memref<16x32xf32, #tpu.memory_space<vmem>>) attributes {dimension_semantics = [#tpu.dimension_semantics<parallel>], iteration_bounds = array<i64: 1>, scalar_prefetch = 0 : i64, scratch_operands = 0 : i64, tpu.core_type = #tpu.core_type<tc>, window_params = [{transform_indices = @transform_0, window_bounds = array<i64: 16, 32>}, {transform_indices = @transform_1, window_bounds = array<i64: 16, 32>}]} {
    %c0 = arith.constant 0 : index
    %c0_0 = arith.constant 0 : index
    %0 = vector.load %arg1[%c0, %c0_0] : memref<16x32xf32, #tpu.memory_space<vmem>>, vector<16x32xf32>
    %1 = arith.mulf %0, %0 : vector<16x32xf32>
    %cst = arith.constant dense<0.000000e+00> : vector<16xf32>
    %2 = vector.multi_reduction <add>, %1, %cst [1] : vector<16x32xf32> to vector<16xf32>
    %3 = vector.shape_cast %2 : vector<16xf32> to vector<16x1xf32>
    %cst_1 = arith.constant 1.000000e-24 : f32
    %4 = vector.broadcast %cst_1 : f32 to vector<16x1xf32>
    %5 = arith.maximumf %3, %4 : vector<16x1xf32>
    %6 = math.rsqrt %5 : vector<16x1xf32>
    %7 = vector.broadcast %6 : vector<16x1xf32> to vector<16x32xf32>
    %8 = arith.mulf %0, %7 : vector<16x32xf32>
    %c0_2 = arith.constant 0 : index
    %c0_3 = arith.constant 0 : index
    %9 = vector.load %arg2[%c0_2, %c0_3] : memref<16x32xf32, #tpu.memory_space<vmem>>, vector<16x32xf32>
    tpu.vector_store %arg2[%c0_2, %c0_3], %8 {strides = array<i32>} : memref<16x32xf32, #tpu.memory_space<vmem>>, vector<16x32xf32>,
    return
  }
  func.func @transform_0(%arg0: i32) -> (i32, i32) {
    %c0_i32 = arith.constant 0 : i32
    %c0_i32_0 = arith.constant 0 : i32
    return %arg0, %c0_i32 : i32, i32
  }
  func.func @transform_1(%arg0: i32) -> (i32, i32) {
    %c0_i32 = arith.constant 0 : i32
    %c0_i32_0 = arith.constant 0 : i32
    return %arg0, %c0_i32 : i32, i32
  }
}

</mosaic_0001>

<bundles_post_ra>
// kernel: tpu_custom_call.1
= control target key start
LH: loop header
LB: loop body
LE: loop exit
PB: predicated region body
PF: predicated region fallthrough
CT: control target
= control target key end

     0   :  { %6 = vsyncpa [#allocation3], 0  ;;  %s163_s0 = inlined_call_operand.hbm [shape: f32[16,32], index: 0, kind: input, shape index: {}]   ;;  %s164_s1 = inlined_call_operand.hbm [shape: f32[16,32], index: 1, kind: output, shape index: {}]  }
   0x1   :  { %7 = vsyncpa [#allocation4], 0  ;;  %s115_s6 = smov [#allocation2]   ;;  %s67_s10 = scalar_lea.hbm %s163_s0, 256 }
   0x2   :  { %s13_s7 = sshll.u32 %s115_s6, 4  ;;  %p68_p0 = scmp.ne.s32.totalorder %s163_s0, %s67_s10  ;;  %s14_s7 = int_to_ptr.vmem [resolvable:$true] %s13_s7 }
   0x3   :  { %p71_p1 = scmp.lt.u32.totalorder %s67_s10, %s163_s0 }
   0x5   :  { %p73_p2 = pnand %p71_p1, %p68_p0 }
   0x7   :  { %76 = shalt.err (!%p73_p2)
}
   0x8   :  { %s77_s15 = scalar_lea.vmem %s14_s7, 256  ;;  %p82_p4 = scmp.lt.s32.totalorder %s14_s7, %s14_s7 }
   0x9   :  { %p78_p3 = scmp.ne.s32.totalorder %s14_s7, %s77_s15  ;;  %p83_p5 = scmp.lt.s32.totalorder %s77_s15, %s77_s15 }
   0xb   :  { %p84_p6 = por %p83_p5, %p82_p4 }
   0xd   :  { %p85_p7 = pnand %p84_p6, %p78_p3 }
   0xf   :  { %88 = shalt.err (!%p85_p7)
}
  0x10   :  { %s116_s16 = smov 128   ;;  %s117_s17 = smov 8  }
  0x11   :  { %19 = dma.hbm_to_vmem [thread:$0]  %s163_s0, 256, %s14_s7, [#allocation3], %s116_s16, %s116_s16, %s117_s17  }
  0x12   :  { %111 = dma.done.wait [#allocation3], 256  }
  0x13   :  { %112 = vsyncadd [#allocation3], 4294967040  ;;  %v23_v0 = vld [vmem:[#allocation2] sm:$0xff]  ;;  %vm27_vm0 = vcmask 261120   ;;  %v24_v1 = vld [vmem:[#allocation2 + $0x8] sm:$0xff]  ;;  %s118_s0 = smov [#allocation5]  }
  0x14   :  { %v25_v2 = vmul.f32 %v23_v0, %v23_v0  ;;  %v26_v3 = vmul.f32 %v24_v1, %v24_v1  ;;  %s47_s20 = sshll.u32 %s118_s0, 4  ;;  %s48_s20 = int_to_ptr.vmem [resolvable:$true] %s47_s20 }
  0x15   :  { %s89_s21 = scalar_lea.vmem %s48_s20, 256  ;;  %p94_p9 = scmp.lt.s32.totalorder %s48_s20, %s48_s20 }
  0x16   :  { %v28_v4 = vsel %vm27_vm0, %v25_v2, 0.0  ;;  %v31_v5 = vsel %vm27_vm0, %v26_v3, 0.0  ;;  %p90_p8 = scmp.ne.s32.totalorder %s48_s20, %s89_s21  ;;  %p95_p10 = scmp.lt.s32.totalorder %s89_s21, %s89_s21 }
  0x17   :  { %29 = vadd.xlane.f32.xlu0 %v28_v4 }
  0x18   :  { %p96_p11 = por %p95_p10, %p94_p9 }
  0x1a   :  { %p97_p12 = pnand %p96_p11, %p90_p8 }
  0x1b   :  { %32 = vadd.xlane.f32.xlu0 %v31_v5 }
  0xa4   :  { %v30_v6 = vpop.xlane.xlu0 %29 }
  0xa5   :  { %v34_v7 = vmax.f32 %v30_v6, 1e-24 }
  0xa7   :  { %63 = vrsqrt.f32 %v34_v7 }
  0xa8   :  { %v33_v8 = vpop.xlane.xlu0 %32 }
  0xa9   :  { %v35_v9 = vmax.f32 %v33_v8, 1e-24 }
  0xab   :  { %65 = vrsqrt.f32 %v35_v9 }
  0xb1   :  { %v64_v10 = vpop.eup %63 }
  0xb2   :  { %v38_v11 = vmul.f32 %v64_v10, %v23_v0 }
  0xb4   :  { %40 = vst.msk [vmem:[#allocation5] sm:$0xff] %vm27_vm0, %v38_v11 }
  0xb5   :  { %v66_v12 = vpop.eup %65 }
  0xb6   :  { %v39_v13 = vmul.f32 %v66_v12, %v24_v1 }
  0xb8   :  { %41 = vst.msk [vmem:[#allocation5 + $0x8] sm:$0xff] %vm27_vm0, %v39_v13 }
  0xb9   :  { %100 = shalt.err (!%p97_p12)
}
  0xba   :  { %s101_s24 = scalar_lea.hbm %s164_s1, 256 }
  0xbb   :  { %p102_p13 = scmp.ne.s32.totalorder %s164_s1, %s101_s24  ;;  %p105_p0 = scmp.lt.u32.totalorder %s101_s24, %s164_s1 }
  0xbd   :  { %p107_p1 = pnand %p105_p0, %p102_p13 }
  0xbf   :  { %110 = shalt.err (!%p107_p1)
}
  0xc0   :  { %53 = dma.vmem_to_hbm [thread:$0]  %s48_s20, 256, %s164_s1, [#allocation4], %s116_s16, %s116_s16, %s117_s17  }
  0xc1   :  { %113 = dma.done.wait [#allocation4], 256  }
  0xc2   :  { %114 = vsyncadd [#allocation4], 4294967040 }
  0xc3   :  { %57 = vsyncpa [#allocation3], 1 }
  0xc4   :  { %58 = vsyncpa [#allocation4], 1 }

</bundles_post_ra>
